<compile_context>
chip_gen: v6e
topology: v6e:2x2x1
jax: 0.10.0
libtpu: 0.0.40
codegen_flags: <defaults>
</compile_context>

<pallas_src>
import functools

import jax
import jax.numpy as jnp
from jax.experimental import pallas as pl
from jax.experimental.pallas import tpu as pltpu

LN_EPS = 1e-5        # torch.nn.LayerNorm default eps
NORM_EPS = 1e-12     # torch.nn.functional.normalize default eps


def _round_up(x, m):
    return ((x + m - 1) // m) * m


def _cdiv(a, b):
    return -(-a // b)


def _choose_tile(hw, batch, max_tile, in_itemsize):
    """Pick the pixel tile: a multiple of 128 (or hw itself when hw <= 128),
    as large as possible to amortize the ~0.35us per-grid-step overhead,
    shrunk only to (a) keep >= ~8 total grid steps so v7x's two TensorCores
    both get work and (b) stay inside a conservative VMEM budget."""
    if hw <= 128:
        return hw                                   # block == full dim is legal
    # conservative per-pixel VMEM bytes: double-buffered feature block,
    # bf16 cast copy, f32 intermediates (32+16+8 ch), double-buffered output.
    bytes_per_px = 64 * in_itemsize * 2 + 64 * 2 + (32 + 16 + 8) * 4 + 3 * 4 * 2
    vmem_cap_px = max(128, ((24 * 2 ** 20) // bytes_per_px) // 128 * 128)
    tile = min(max_tile, _round_up(hw, 128), vmem_cap_px)
    tile = max(128, (tile // 128) * 128)
    while tile > 128 and batch * _cdiv(hw, tile) < 8:
        tile = max(128, _round_up(tile // 2, 128))
    return tile


def _pack_params(params):
    """Pack decoder params into two constant blocks.

       wblk (64, 128) bf16:  rows  0:32, cols 0:64  = W1^T  (Linear 64->32)
                             rows 32:48, cols 0:32  = W2^T  (Linear 32->16)
                             rows 48:51, cols 0:16  = W3^T  (Linear 16->3), rest 0
       pblk (32, 8)   f32 :  cols [g1 | b1 | g2 | b2 | b3 | 0 | 0 | 0]
    """
    w1, g1, b1, w2, g2, b2, w3, b3 = params
    f32 = lambda a: jnp.asarray(a, jnp.float32)
    wblk = jnp.zeros((64, 128), jnp.bfloat16)
    wblk = wblk.at[0:32, 0:64].set(f32(w1).T.astype(jnp.bfloat16))
    wblk = wblk.at[32:48, 0:32].set(f32(w2).T.astype(jnp.bfloat16))
    wblk = wblk.at[48:51, 0:16].set(f32(w3).T.astype(jnp.bfloat16))
    pblk = jnp.zeros((32, 8), jnp.float32)
    pblk = pblk.at[:, 0].set(f32(g1).reshape(-1))
    pblk = pblk.at[:, 1].set(f32(b1).reshape(-1))
    pblk = pblk.at[0:16, 2].set(f32(g2).reshape(-1))
    pblk = pblk.at[0:16, 3].set(f32(b2).reshape(-1))
    pblk = pblk.at[0:3, 4].set(f32(b3).reshape(-1))
    return wblk, pblk


def _decoder_kernel(x_ref, w_ref, p_ref, o_ref):
    """Per-pixel MLP decoder; channels on sublanes, pixels on lanes.

       x_ref : (64, T)   backbone features in their native dtype
       w_ref : (64, 128) bf16 packed [W1^T | W2^T | W3^T]  (see _pack_params)
       p_ref : (32, 8)   f32 packed gamma/beta/bias
       o_ref : (3, T)    per-pixel L2-normalized output (float32)
    """
    # bf16 MXU operands; no-op if the features already arrive as bf16.
    x = x_ref[...].astype(jnp.bfloat16)                                   # (64, T)
    w = w_ref[...]                                                        # tiny

    # ---- Linear 64 -> 32 (no bias) + LayerNorm(32) + ReLU -----------------
    h = jnp.dot(w[0:32, 0:64], x, preferred_element_type=jnp.float32)    # (32, T)
    mu = jnp.mean(h, axis=0, keepdims=True)
    var = jnp.mean((h - mu) * (h - mu), axis=0, keepdims=True)           # biased var
    h = (h - mu) * jax.lax.rsqrt(var + LN_EPS)
    h = h * p_ref[:, 0:1] + p_ref[:, 1:2]
    h = jnp.maximum(h, 0.0).astype(jnp.bfloat16)

    # ---- Linear 32 -> 16 (no bias) + LayerNorm(16) + ReLU -----------------
    h = jnp.dot(w[32:48, 0:32], h, preferred_element_type=jnp.float32)   # (16, T)
    mu = jnp.mean(h, axis=0, keepdims=True)
    var = jnp.mean((h - mu) * (h - mu), axis=0, keepdims=True)
    h = (h - mu) * jax.lax.rsqrt(var + LN_EPS)
    h = h * p_ref[0:16, 2:3] + p_ref[0:16, 3:4]
    h = jnp.maximum(h, 0.0).astype(jnp.bfloat16)

    # ---- Linear 16 -> 3 (bias); padded rows 3..7 stay exactly zero --------
    out = jnp.dot(w[48:56, 0:16], h, preferred_element_type=jnp.float32)  # (8, T)
    out = out + p_ref[0:8, 4:5]

    # ---- F.normalize over the 3 channels (sublane axis); rsqrt -> EUP -----
    ssq = jnp.sum(out * out, axis=0, keepdims=True)                       # (1, T)
    out = out * jax.lax.rsqrt(jnp.maximum(ssq, NORM_EPS * NORM_EPS))

    o_ref[...] = out[0:3, :].astype(o_ref.dtype)


def _decoder_pallas(feats, wblk, pblk, *, tile):
    """feats: (B, 64, HW) in native dtype. Returns (B, 3, HW) float32."""
    b, c, hw = feats.shape
    assert c == 64
    assert tile == hw or tile % 128 == 0
    grid = (b, _cdiv(hw, tile))
    in_itemsize = jnp.dtype(feats.dtype).itemsize

    cost = pl.CostEstimate(
        flops=2 * (64 * 32 + 32 * 16 + 16 * 3) * hw * b,
        transcendentals=3 * hw * b,                               # rsqrt x3 per pixel
        bytes_accessed=(64 * in_itemsize + 3 * 4) * hw * b + 64 * 128 * 2 + 32 * 8 * 4,
    )

    per_step_bytes = tile * (64 * in_itemsize * 2 + 64 * 2 + (32 + 16 + 8) * 4 + 3 * 4 * 2)
    vmem_limit = int(min(48 * 2 ** 20, max(32 * 2 ** 20, 2 * per_step_bytes)))

    const = lambda shape: pl.BlockSpec(shape, lambda i, j: (0, 0))

    return pl.pallas_call(
        _decoder_kernel,
        out_shape=jax.ShapeDtypeStruct((b, 3, hw), jnp.float32),
        grid_spec=pltpu.PrefetchScalarGridSpec(
            num_scalar_prefetch=0,
            grid=grid,
            in_specs=[
                pl.BlockSpec((None, 64, tile), lambda i, j: (i, 0, j)),   # features
                const((64, 128)),                                          # packed W (bf16)
                const((32, 8)),                                            # packed g/b (f32)
            ],
            out_specs=pl.BlockSpec((None, 3, tile), lambda i, j: (i, 0, j)),
        ),
        compiler_params=pltpu.CompilerParams(
            dimension_semantics=("parallel", "parallel"),
            vmem_limit_bytes=vmem_limit),
        cost_estimate=cost,
    )(feats, wblk, pblk)


@functools.partial(jax.jit, static_argnames=("max_tile",))
def suction_sampler_forward(features_nchw, params, *, max_tile=8192):
    """features_nchw: (B, 64, H, W) backbone output (any float dtype; read as-is).
       Returns (B, 3, H, W) float32, L2-normalized over the channel dim (dim=1)."""
    b, c, h, w = features_nchw.shape
    assert c == 64, "decoder expects 64-channel backbone features"
    hw = h * w
    tile = _choose_tile(hw, b, max_tile, jnp.dtype(features_nchw.dtype).itemsize)
    feats = features_nchw.reshape(b, c, hw)            # metadata-only, no copy
    wblk, pblk = _pack_params(params)
    out = _decoder_pallas(feats, wblk, pblk, tile=tile)
    return out.reshape(b, 3, h, w)


def init_params(key):
    """Deterministic parameter init matching the torch module's shapes.
       Linear weights stored as (in, out); rounded to bf16-representable values
       so the reference and the explicit-bf16 MXU path agree tightly."""
    k1, k2, k3, k4 = jax.random.split(key, 4)
    bf = lambda a: a.astype(jnp.bfloat16).astype(jnp.float32)
    w1 = bf(jax.random.normal(k1, (64, 32), jnp.float32) * 0.1)   # Linear(64,32,bias=False)
    g1 = jnp.ones((1, 32), jnp.float32)                            # LayerNorm(32) weight
    b1 = jnp.zeros((1, 32), jnp.float32)                           # LayerNorm(32) bias
    w2 = bf(jax.random.normal(k2, (32, 16), jnp.float32) * 0.1)   # Linear(32,16,bias=False)
    g2 = jnp.ones((1, 16), jnp.float32)
    b2 = jnp.zeros((1, 16), jnp.float32)
    w3 = bf(jax.random.normal(k3, (16, 3), jnp.float32) * 0.1)    # Linear(16,3)
    b3 = bf(jax.random.normal(k4, (1, 3), jnp.float32) * 0.01)
    return (w1, g1, b1, w2, g2, b2, w3, b3)


def reference_forward(features_nchw, params):
    """Pure-JAX reference of the decoder + F.normalize path (NHWC-flattened, as
    in the torch code).  Mirrors the kernel's intentional bf16 quantization of
    the matmul operands; the f32 torch model differs only by bf16 matmul noise."""
    w1, g1, b1, w2, g2, b2, w3, b3 = params
    b, c, h, w = features_nchw.shape
    x = jnp.transpose(features_nchw, (0, 2, 3, 1)).reshape(-1, c)

    bf = lambda a: a.astype(jnp.bfloat16).astype(jnp.float32)
    mm = lambda a, m: jax.lax.dot(bf(a), bf(m),
                                  precision=jax.lax.Precision.HIGHEST,
                                  preferred_element_type=jnp.float32)

    def ln(v, g, bb):
        mu = jnp.mean(v, -1, keepdims=True)
        var = jnp.mean((v - mu) ** 2, -1, keepdims=True)
        return (v - mu) * jax.lax.rsqrt(var + LN_EPS) * g + bb

    hdd = jnp.maximum(ln(mm(x, w1), g1, b1), 0.0)
    hdd = jnp.maximum(ln(mm(hdd, w2), g2, b2), 0.0)
    out = mm(hdd, w3) + b3
    ssq = jnp.sum(out * out, -1, keepdims=True)
    out = out * jax.lax.rsqrt(jnp.maximum(ssq, NORM_EPS * NORM_EPS))
    return out.reshape(b, h, w, 3).transpose(0, 3, 1, 2)


if __name__ == "__main__":
    key = jax.random.PRNGKey(0)
    kp, kx = jax.random.split(key)

    params = init_params(kp)

    # Small backbone-feature input: B=2, C=64 (res_unet output width), H=W=16.
    B, C, H, W = 2, 64, 16, 16
    features = jax.random.normal(kx, (B, C, H, W), jnp.float32)

    out = suction_sampler_forward(features, params)
    out = jax.block_until_ready(out)

    ref = reference_forward(features, params)

    assert out.shape == (B, 3, H, W)
    assert bool(jnp.all(jnp.isfinite(out)))
    # Tolerance covers the occasional round-to-nearest flip on the bf16
    # intermediate casts between the kernel and the mirrored reference.
    assert jnp.allclose(out, ref, atol=2e-3, rtol=2e-3), "mismatch vs reference"
    # channel vectors are unit-norm
    assert jnp.allclose(jnp.linalg.norm(out, axis=1), 1.0, atol=1e-3)

    print("KERNEL_OK")
</pallas_src>

<mosaic_0001>
module attributes {stable_mosaic.version = 11 : i64} {
  func.func @_decoder_kernel(%arg0: i32, %arg1: i32, %arg2: memref<1x64x128xf32, #tpu.memory_space<vmem>>, %arg3: memref<64x128xbf16, #tpu.memory_space<vmem>>, %arg4: memref<32x8xf32, #tpu.memory_space<vmem>>, %arg5: memref<1x3x128xf32, #tpu.memory_space<vmem>>) attributes {dimension_semantics = [#tpu.dimension_semantics<parallel>, #tpu.dimension_semantics<parallel>], iteration_bounds = array<i64: 2, 2>, scalar_prefetch = 0 : i64, scratch_operands = 0 : i64, tpu.core_type = #tpu.core_type<tc>, window_params = [{transform_indices = @transform_0, window_bounds = array<i64: 1, 64, 128>}, {pipeline_mode = #tpu.pipeline_mode<synchronous>, transform_indices = @transform_1, window_bounds = array<i64: 64, 128>}, {pipeline_mode = #tpu.pipeline_mode<synchronous>, transform_indices = @transform_2, window_bounds = array<i64: 32, 8>}, {transform_indices = @transform_3, window_bounds = array<i64: 1, 3, 128>}]} {
    %c0 = arith.constant 0 : index
    %c0_0 = arith.constant 0 : index
    %c0_1 = arith.constant 0 : index
    %0 = vector.load %arg2[%c0, %c0_0, %c0_1] : memref<1x64x128xf32, #tpu.memory_space<vmem>>, vector<1x64x128xf32>
    %1 = vector.shape_cast %0 : vector<1x64x128xf32> to vector<64x128xf32>
    %2 = arith.truncf %1 : vector<64x128xf32> to vector<64x128xbf16>
    %c0_2 = arith.constant 0 : index
    %c0_3 = arith.constant 0 : index
    %3 = vector.load %arg3[%c0_2, %c0_3] : memref<64x128xbf16, #tpu.memory_space<vmem>>, vector<64x128xbf16>
    %4 = vector.extract_strided_slice %3 {offsets = [0, 0], sizes = [32, 64], strides = [1, 1]} : vector<64x128xbf16> to vector<32x64xbf16>
    %cst = arith.constant dense<0.000000e+00> : vector<32x128xf32>
    %5 = tpu.matmul %4, %2, %cst {dimension_numbers = #tpu.dot_dimension_numbers<[1], [0], [0], [1], [0, 0, 1, 1], [], []>} : vector<32x64xbf16>, vector<64x128xbf16>, vector<32x128xf32> -> vector<32x128xf32>
    %cst_4 = arith.constant dense<0.000000e+00> : vector<128xf32>
    %6 = vector.multi_reduction <add>, %5, %cst_4 [0] : vector<32x128xf32> to vector<128xf32>
    %7 = vector.shape_cast %6 : vector<128xf32> to vector<1x128xf32>
    %cst_5 = arith.constant 3.200000e+01 : f32
    %8 = vector.broadcast %cst_5 : f32 to vector<1x128xf32>
    %9 = arith.divf %7, %8 : vector<1x128xf32>
    %10 = vector.broadcast %9 : vector<1x128xf32> to vector<32x128xf32>
    %11 = arith.subf %5, %10 : vector<32x128xf32>
    %12 = vector.broadcast %9 : vector<1x128xf32> to vector<32x128xf32>
    %13 = arith.subf %5, %12 : vector<32x128xf32>
    %14 = arith.mulf %11, %13 : vector<32x128xf32>
    %cst_6 = arith.constant dense<0.000000e+00> : vector<128xf32>
    %15 = vector.multi_reduction <add>, %14, %cst_6 [0] : vector<32x128xf32> to vector<128xf32>
    %16 = vector.shape_cast %15 : vector<128xf32> to vector<1x128xf32>
    %cst_7 = arith.constant 3.200000e+01 : f32
    %17 = vector.broadcast %cst_7 : f32 to vector<1x128xf32>
    %18 = arith.divf %16, %17 : vector<1x128xf32>
    %19 = vector.broadcast %9 : vector<1x128xf32> to vector<32x128xf32>
    %20 = arith.subf %5, %19 : vector<32x128xf32>
    %cst_8 = arith.constant 9.99999974E-6 : f32
    %21 = vector.broadcast %cst_8 : f32 to vector<1x128xf32>
    %22 = arith.addf %18, %21 : vector<1x128xf32>
    %23 = math.rsqrt %22 : vector<1x128xf32>
    %24 = vector.broadcast %23 : vector<1x128xf32> to vector<32x128xf32>
    %25 = arith.mulf %20, %24 : vector<32x128xf32>
    %c0_9 = arith.constant 0 : index
    %c0_10 = arith.constant 0 : index
    %26 = vector.load %arg4[%c0_9, %c0_10] : memref<32x8xf32, #tpu.memory_space<vmem>>, vector<32x1xf32>
    %27 = vector.broadcast %26 : vector<32x1xf32> to vector<32x128xf32>
    %28 = arith.mulf %25, %27 : vector<32x128xf32>
    %c0_11 = arith.constant 0 : index
    %c1 = arith.constant 1 : index
    %29 = vector.load %arg4[%c0_11, %c1] : memref<32x8xf32, #tpu.memory_space<vmem>>, vector<32x1xf32>
    %30 = vector.broadcast %29 : vector<32x1xf32> to vector<32x128xf32>
    %31 = arith.addf %28, %30 : vector<32x128xf32>
    %cst_12 = arith.constant 0.000000e+00 : f32
    %32 = vector.broadcast %cst_12 : f32 to vector<32x128xf32>
    %33 = arith.maximumf %31, %32 : vector<32x128xf32>
    %34 = arith.truncf %33 : vector<32x128xf32> to vector<32x128xbf16>
    %35 = vector.extract_strided_slice %3 {offsets = [32, 0], sizes = [16, 32], strides = [1, 1]} : vector<64x128xbf16> to vector<16x32xbf16>
    %cst_13 = arith.constant dense<0.000000e+00> : vector<16x128xf32>
    %36 = tpu.matmul %35, %34, %cst_13 {dimension_numbers = #tpu.dot_dimension_numbers<[1], [0], [0], [1], [0, 0, 1, 1], [], []>} : vector<16x32xbf16>, vector<32x128xbf16>, vector<16x128xf32> -> vector<16x128xf32>
    %cst_14 = arith.constant dense<0.000000e+00> : vector<128xf32>
    %37 = vector.multi_reduction <add>, %36, %cst_14 [0] : vector<16x128xf32> to vector<128xf32>
    %38 = vector.shape_cast %37 : vector<128xf32> to vector<1x128xf32>
    %cst_15 = arith.constant 1.600000e+01 : f32
    %39 = vector.broadcast %cst_15 : f32 to vector<1x128xf32>
    %40 = arith.divf %38, %39 : vector<1x128xf32>
    %41 = vector.broadcast %40 : vector<1x128xf32> to vector<16x128xf32>
    %42 = arith.subf %36, %41 : vector<16x128xf32>
    %43 = vector.broadcast %40 : vector<1x128xf32> to vector<16x128xf32>
    %44 = arith.subf %36, %43 : vector<16x128xf32>
    %45 = arith.mulf %42, %44 : vector<16x128xf32>
    %cst_16 = arith.constant dense<0.000000e+00> : vector<128xf32>
    %46 = vector.multi_reduction <add>, %45, %cst_16 [0] : vector<16x128xf32> to vector<128xf32>
    %47 = vector.shape_cast %46 : vector<128xf32> to vector<1x128xf32>
    %cst_17 = arith.constant 1.600000e+01 : f32
    %48 = vector.broadcast %cst_17 : f32 to vector<1x128xf32>
    %49 = arith.divf %47, %48 : vector<1x128xf32>
    %50 = vector.broadcast %40 : vector<1x128xf32> to vector<16x128xf32>
    %51 = arith.subf %36, %50 : vector<16x128xf32>
    %cst_18 = arith.constant 9.99999974E-6 : f32
    %52 = vector.broadcast %cst_18 : f32 to vector<1x128xf32>
    %53 = arith.addf %49, %52 : vector<1x128xf32>
    %54 = math.rsqrt %53 : vector<1x128xf32>
    %55 = vector.broadcast %54 : vector<1x128xf32> to vector<16x128xf32>
    %56 = arith.mulf %51, %55 : vector<16x128xf32>
    %c0_19 = arith.constant 0 : index
    %c2 = arith.constant 2 : index
    %57 = vector.load %arg4[%c0_19, %c2] : memref<32x8xf32, #tpu.memory_space<vmem>>, vector<16x1xf32>
    %58 = vector.broadcast %57 : vector<16x1xf32> to vector<16x128xf32>
    %59 = arith.mulf %56, %58 : vector<16x128xf32>
    %c0_20 = arith.constant 0 : index
    %c3 = arith.constant 3 : index
    %60 = vector.load %arg4[%c0_20, %c3] : memref<32x8xf32, #tpu.memory_space<vmem>>, vector<16x1xf32>
    %61 = vector.broadcast %60 : vector<16x1xf32> to vector<16x128xf32>
    %62 = arith.addf %59, %61 : vector<16x128xf32>
    %cst_21 = arith.constant 0.000000e+00 : f32
    %63 = vector.broadcast %cst_21 : f32 to vector<16x128xf32>
    %64 = arith.maximumf %62, %63 : vector<16x128xf32>
    %65 = arith.truncf %64 : vector<16x128xf32> to vector<16x128xbf16>
    %66 = vector.extract_strided_slice %3 {offsets = [48, 0], sizes = [8, 16], strides = [1, 1]} : vector<64x128xbf16> to vector<8x16xbf16>
    %cst_22 = arith.constant dense<0.000000e+00> : vector<8x128xf32>
    %67 = tpu.matmul %66, %65, %cst_22 {dimension_numbers = #tpu.dot_dimension_numbers<[1], [0], [0], [1], [0, 0, 1, 1], [], []>} : vector<8x16xbf16>, vector<16x128xbf16>, vector<8x128xf32> -> vector<8x128xf32>
    %c0_23 = arith.constant 0 : index
    %c4 = arith.constant 4 : index
    %68 = vector.load %arg4[%c0_23, %c4] : memref<32x8xf32, #tpu.memory_space<vmem>>, vector<8x1xf32>
    %69 = vector.broadcast %68 : vector<8x1xf32> to vector<8x128xf32>
    %70 = arith.addf %67, %69 : vector<8x128xf32>
    %71 = arith.mulf %70, %70 : vector<8x128xf32>
    %cst_24 = arith.constant dense<0.000000e+00> : vector<128xf32>
    %72 = vector.multi_reduction <add>, %71, %cst_24 [0] : vector<8x128xf32> to vector<128xf32>
    %73 = vector.shape_cast %72 : vector<128xf32> to vector<1x128xf32>
    %cst_25 = arith.constant 1.000000e-24 : f32
    %74 = vector.broadcast %cst_25 : f32 to vector<1x128xf32>
    %75 = arith.maximumf %73, %74 : vector<1x128xf32>
    %76 = math.rsqrt %75 : vector<1x128xf32>
    %77 = vector.broadcast %76 : vector<1x128xf32> to vector<8x128xf32>
    %78 = arith.mulf %70, %77 : vector<8x128xf32>
    %79 = vector.extract_strided_slice %78 {offsets = [0, 0], sizes = [3, 128], strides = [1, 1]} : vector<8x128xf32> to vector<3x128xf32>
    %c0_26 = arith.constant 0 : index
    %c0_27 = arith.constant 0 : index
    %c0_28 = arith.constant 0 : index
    %80 = vector.load %arg5[%c0_26, %c0_27, %c0_28] : memref<1x3x128xf32, #tpu.memory_space<vmem>>, vector<1x3x128xf32>
    %81 = vector.shape_cast %80 : vector<1x3x128xf32> to vector<3x128xf32>
    %82 = vector.shape_cast %79 : vector<3x128xf32> to vector<1x3x128xf32>
    tpu.vector_store %arg5[%c0_26, %c0_27, %c0_28], %82 {strides = array<i32>} : memref<1x3x128xf32, #tpu.memory_space<vmem>>, vector<1x3x128xf32>,
    return
  }
  func.func @transform_0(%arg0: i32, %arg1: i32) -> (i32, i32, i32) {
    %c0_i32 = arith.constant 0 : i32
    %c0_i32_0 = arith.constant 0 : i32
    return %arg0, %c0_i32, %arg1 : i32, i32, i32
  }
  func.func @transform_1(%arg0: i32, %arg1: i32) -> (i32, i32) {
    %c0_i32 = arith.constant 0 : i32
    %c0_i32_0 = arith.constant 0 : i32
    %c0_i32_1 = arith.constant 0 : i32
    return %c0_i32, %c0_i32_0 : i32, i32
  }
  func.func @transform_2(%arg0: i32, %arg1: i32) -> (i32, i32) {
    %c0_i32 = arith.constant 0 : i32
    %c0_i32_0 = arith.constant 0 : i32
    %c0_i32_1 = arith.constant 0 : i32
    return %c0_i32, %c0_i32_0 : i32, i32
  }
  func.func @transform_3(%arg0: i32, %arg1: i32) -> (i32, i32, i32) {
    %c0_i32 = arith.constant 0 : i32
    %c0_i32_0 = arith.constant 0 : i32
    return %arg0, %c0_i32, %arg1 : i32, i32, i32
  }
}

</mosaic_0001>

<bundles_post_ra>
// kernel: suction_sampler_forward.1
= control target key start
LH: loop header
LB: loop body
LE: loop exit
PB: predicated region body
PF: predicated region fallthrough
CT: control target
= control target key end

     0   :  { %s905_s12 = smov 0   ;;  %s907_s13 = smov 0   ;;  %s1036_s0 = inlined_call_operand.vmem [shape: f32[2,64,256], index: 0, kind: input, shape index: {}]   ;;  %s1037_s1 = inlined_call_operand.vmem [shape: bf16[64,128], index: 1, kind: input, shape index: {}]   ;;  %s1038_s2 = inlined_call_operand.vmem [shape: f32[32,8], index: 2, kind: input, shape index: {}]   ;;  %s1039_s3 = inlined_call_operand.vmem [shape: f32[2,3,256], index: 3, kind: output, shape index: {}]  }
   0x1   :  { %s909_s14 = smov 0   ;;  %s911_s15 = smov 0  }
   0x2   :  { %s913_s16 = smov 0   ;;  %s915_s17 = smov 0  }
   0x3   :  { %s917_s18 = smov 0  }
   0x4 LB: > { %s22_s19 = sadd.s32 1, %s868_s16  ;;  %s25_s20 = sadd.s32 1, %s872_s17  ;;  %s876_s18 = sphi %s917_s18, %s13_s18   ;;  %s872_s17 = sphi %s915_s17, %s1045_s17   ;;  %s868_s16 = sphi %s913_s16, %s1044_s16   ;;  %s864_s15 = sphi %s911_s15, %s1043_s15   ;;  %s860_s14 = sphi %s909_s14, %s1042_s14   ;;  %s856_s13 = sphi %s907_s13, %s1041_s13   ;;  %s852_s12 = sphi %s905_s12, %s1040_s12  }
   0x5   : > { %p23_p0 = scmp.ge.s32.totalorder %s22_s19, 2  ;;  %p41_p1 = scmp.ne.s32.totalorder %s856_s13, %s852_s12 }
   0x6   : > { %p42_p2 = scmp.eq.s32.totalorder %s876_s18, 0  ;;  %s34_s24 = sadd.s32 1, %s856_s13 }
   0x7   : > { %s1047_s19 = smov (%p23_p0, %s22_s19), 0  ;;  %s1049_s20 = smov (!%p23_p0, %s25_s20), %s872_s17 }
   0x8   : > { %p43_p3 = por %p42_p2, %p41_p1  ;;  %p27_p4 = scmp.ge.s32.totalorder %s1049_s20, 2 }
   0x9   : > { %s30_s21 = ssub.s32 %s868_s16, %s1047_s19  ;;  %p687_p6 = scmp.ge.s32.totalorder %s876_s18, 4 }
   0xa   : > { %s1051_s20 = smov (%p27_p4, %s1049_s20), 0 }
   0xb   : > { %s29_s22 = ssub.s32 %s872_s17, %s1051_s20  ;;  %143 = sbr.rel (%p687_p6) target bundleno = 26 (0x1a), region = 24 }
   0xc   : > { %s31_s23 = sor.u32 %s30_s21, %s29_s22 }
   0xd   : > { %p32_p5 = scmp.eq.s32.totalorder %s31_s23, 0 }
   0xf   : > { %s956_s25 = scalar_select %p32_p5, %s856_s13, %s34_s24  }
  0x10   : > { %146 = sbr.rel (!%p43_p3) target bundleno = 26 (0x1a), region = 28  ;;  %s148_s26 = sand.u32 (%p43_p3), 1, %s856_s13  }
  0x11   : > { %s689_s27 = sshll.u32 (%p43_p3), %s872_s17, 4  ;;  %s688_s28 = sshll.u32 (%p43_p3), %s148_s26, 6 }
  0x12   : > { %s152_s29 = sadd.s32 (%p43_p3), %s868_s16, %s689_s27  ;;  %s150_s7 = scalar_lea.vmem (%p43_p3), [#allocation2], %s688_s28 }
  0x13   : > { %s690_s30 = sshll.u32 (%p43_p3), %s152_s29, 3 }
  0x14   : > { %s154_s6 = scalar_lea.vmem (%p43_p3), %s1036_s0, %s690_s30 }
  0x15   : > { %v197_v0 = vld [vmem:[%s154_s6] sm:$0xff]  ;;  %v199_v1 = vld [vmem:[%s154_s6 + $0x10] sm:$0xff] }
  0x16   : > { %v201_v2 = vld [vmem:[%s154_s6 + $0x20] sm:$0xff]  ;;  %198 = vst [vmem:[%s150_s7] sm:$0xff] %v197_v0  ;;  %200 = vst [vmem:[%s150_s7 + $0x8] sm:$0xff] %v199_v1  ;;  %v203_v3 = vld [vmem:[%s154_s6 + $0x30] sm:$0xff] }
  0x17   : > { %202 = vst [vmem:[%s150_s7 + $0x10] sm:$0xff] %v201_v2  ;;  %v205_v4 = vld [vmem:[%s154_s6 + $0x40] sm:$0xff]  ;;  %v207_v5 = vld [vmem:[%s154_s6 + $0x50] sm:$0xff]  ;;  %204 = vst [vmem:[%s150_s7 + $0x18] sm:$0xff] %v203_v3 }
  0x18   : > { %206 = vst [vmem:[%s150_s7 + $0x20] sm:$0xff] %v205_v4  ;;  %208 = vst [vmem:[%s150_s7 + $0x28] sm:$0xff] %v207_v5  ;;  %v209_v6 = vld [vmem:[%s154_s6 + $0x60] sm:$0xff]  ;;  %v211_v7 = vld [vmem:[%s154_s6 + $0x70] sm:$0xff] }
  0x19   : > { %210 = vst [vmem:[%s150_s7 + $0x30] sm:$0xff] %v209_v6  ;;  %212 = vst [vmem:[%s150_s7 + $0x38] sm:$0xff] %v211_v7 }
  0x1a PF: > { %p691_p7 = scmp.ge.s32.totalorder %s876_s18, 1  ;;  %p217_p8 = scmp.lt.s32.totalorder %s876_s18, 5 }
  0x1c   : > { %p218_p9 = pnand %p691_p7, %p217_p8 }
  0x1d   : > { %s224_s8 = sand.u32 (!%p218_p9), 1, %s852_s12   ;;  %p250_p10 = scmp.lt.s32.totalorder (!%p218_p9), %s864_s15, 1 }
  0x1e   : > { %221 = sbr.rel (%p218_p9) target bundleno = 821 (0x335), region = 66  ;;  %s692_s11 = sshll.u32 (!%p218_p9), %s224_s8, 6 }
  0x1f   : > { %s226_s23 = scalar_lea.vmem (!%p218_p9), [#allocation2], %s692_s11  ;;  %p252_p11 = scmp.lt.s32.totalorder (!%p218_p9), %s860_s14, 1 }
  0x23   : > { %v813_v8 = vld [vmem:[%s1037_s1] sm:$0xff]   ;;  %vm288_vm0 = vcmask 523264   ;;  %v381_v9 = vld [vmem:[%s1038_s2 + $0x10] sm:$0xff]  ;;  %v266_v11 = vld [vmem:[%s226_s23 + $0x38] sm:$0xff]  ;;  %v878_v13 = vmov 0   ;;  %v879_v14 = vmov 1  }
  0x24   : > { %723 = vmatprep.mubr.msk.bf16.mxu0 %vm288_vm0, %v813_v8  ;;  %v265_v10 = vld [vmem:[%s226_s23 + $0x30] sm:$0xff]  ;;  %v263_v12 = vld [vmem:[%s226_s23 + $0x20] sm:$0xff]  ;;  %804 = vset.pattern.permute.xlu0 %v878_v13  ;;  %v264_v16 = vld [vmem:[%s226_s23 + $0x28] sm:$0xff]  ;;  %v880_v28 = vmov 0.0   ;;  %vm881_vm1 = vmmov 0   ;;  %v882_v29 = vmov 2  }
  0x25   : > { %805 = vset.pattern.permute.xlu1 %v879_v14  ;;  %v270_v15 = vpack.c.bf16 %v266_v11, %v265_v10  ;;  %395 = vperm.xlu0 %804, %v381_v9   ;;  %v269_v17 = vpack.c.bf16 %v264_v16, %v263_v12  ;;  %v261_v18 = vld [vmem:[%s226_s23 + $0x10] sm:$0xff]  ;;  %v262_v19 = vld [vmem:[%s226_s23 + $0x18] sm:$0xff]  ;;  %v259_v22 = vld [vmem:[%s226_s23] sm:$0xff]  ;;  %v883_v30 = vmov 3   ;;  %vm438_vm2 = vcmask 261120   ;;  %s1053_s15 = smov (!%p250_p10, %s864_s15), 1 }
  0x26   : > { %416 = vperm.xlu1 %805, %v381_v9   ;;  %v382_v20 = vld [vmem:[%s1038_s2 + $0x18] sm:$0xff]  ;;  %v268_v21 = vpack.c.bf16 %v262_v19, %v261_v18  ;;  %v260_v23 = vld [vmem:[%s226_s23 + $0x8] sm:$0xff]  ;;  %v981_v24 = vld [vmem:[%s1038_s2] sm:$0xff]  ;;  %727 = vmatprep.subr.bf16.mxu1 %v880_v28  ;;  %vm541_vm3 = vcmask 130048   ;;  %s1055_s14 = smov (!%p252_p11, %s860_s14), 1  ;;  %s693_s9 = sshll.u32 %s1053_s15, 1 }
  0x27   : > { %715 = vmatprep.subr.bf16.mxu0 %v270_v15  ;;  %v380_v25 = vld [vmem:[%s1038_s2 + $0x8] sm:$0xff]  ;;  %v267_v26 = vpack.c.bf16 %v260_v23, %v259_v22  ;;  %731 = vmatprep.mubr.msk.bf16.mxu1 %vm881_vm1, %v880_v28  ;;  %s255_s10 = sadd.s32 %s693_s9, %s1055_s14 }
  0x28   : > { %716 = vmatpush3.bf16.msra.mxu0 %v270_v15  ;;  %v814_v27 = vld [vmem:[%s1037_s1 + $0x8] sm:$0xff]   ;;  %s694_s11 = sshll.u32 %s255_s10, 2 }
  0x29   : > { %717 = vmatprep.subr.bf16.mxu0 %v269_v17  ;;  %400 = vperm.xlu0 %804, %v382_v20   ;;  %s257_s23 = scalar_lea.vmem %s1039_s3, %s694_s11 }
  0x2a   : > { %420 = vperm.xlu1 %805, %v382_v20  }
  0x2c   : > { %718 = vmatpush3.bf16.msra.mxu0 %v269_v17 }
  0x2d   : > { %719 = vmatprep.subr.bf16.mxu0 %v268_v21  ;;  %385 = vperm.xlu0 %804, %v981_v24  }
  0x2e   : > { %806 = vset.pattern.permute.xlu1 %v878_v13 }
  0x2f   : > { %390 = vperm.xlu1 %806, %v380_v25  }
  0x30   : > { %720 = vmatpush3.bf16.msra.mxu0 %v268_v21 }
  0x31   : > { %721 = vmatprep.subr.bf16.mxu0 %v267_v26  ;;  %807 = vset.pattern.permute.xlu0 %v879_v14 }
  0x32   : > { %408 = vperm.xlu0 %807, %v981_v24  }
  0x33   : > { %808 = vset.pattern.permute.xlu1 %v879_v14 }
  0x34   : > { %722 = vmatpush3.bf16.msra.mxu0 %v267_v26  ;;  %412 = vperm.xlu1 %808, %v380_v25  }
  0x36   : > { %810 = vset.pattern.permute.xlu0 %v882_v29 }
  0x37   : > { %724 = vmatmul.mubr.msk.bf16.vlgmr.msra.gmra.mxu0 %vm288_vm0, %v814_v27  ;;  %517 = vperm.xlu0 %810, %v380_v25  }
  0x38   : > { %809 = vset.pattern.permute.xlu1 %v882_v29  ;;  %v815_v29 = vld [vmem:[%s1037_s1 + $0x10] sm:$0xff]  }
  0x39   : > { %512 = vperm.xlu1 %809, %v981_v24  }
  0x3d   : > { %811 = vset.pattern.permute.xlu1 %v883_v30  ;;  %v884_v30 = vmov 4  }
  0x3e   : > { %523 = vperm.xlu1 %811, %v981_v24   ;;  %812 = vset.pattern.permute.xlu0 %v884_v30 }
  0x3f   : > { %538 = vperm.xlu0 %812, %v981_v24  }
  0x42   : > { %527 = vperm.xlu1 %811, %v380_v25  }
  0xa0   : > { %v396_v0 = vpop.permute.xlu0 %395 }
  0xa1   : > { %v417_v1 = vpop.permute.xlu1 %416 }
  0xa4   : > { %v401_v2 = vpop.permute.xlu0 %400 }
  0xa5   : > { %v421_v3 = vpop.permute.xlu1 %420 }
  0xa8   : > { %v386_v5 = vpop.permute.xlu0 %385 }
  0xaa   : > { %v391_v4 = vpop.permute.xlu1 %390 }
  0xad   : > { %v409_v12 = vpop.permute.xlu0 %408 }
  0xaf   : > { %v413_v11 = vpop.permute.xlu1 %412 }
  0xf7   : > { %v725_v31 = vpop.f32.mrf.mxu0 }
  0xf9   : > { %v329_v32 = vpop.f32.mrf.mxu0 }
  0xfb   : > { %v726_v33 = vpop.f32.mrf.mxu0 }
  0xfd   : > { %v332_v34 = vpop.f32.mrf.mxu0 }
  0xfe   : > { %v344_v35 = vadd.f32 %v332_v34, %v329_v32 }
 0x100   : > { %v345_v36 = vadd.f32 %v725_v31, %v344_v35 }
 0x102   : > { %v346_v37 = vadd.f32 %v726_v33, %v345_v36 }
 0x104   : > { %v347_v38 = vrot.slane %v346_v37, 4 }
 0x106   : > { %v348_v39 = vadd.f32 %v347_v38, %v346_v37 }
 0x108   : > { %v349_v40 = vrot.slane %v348_v39, 2 }
 0x10a   : > { %v350_v41 = vadd.f32 %v349_v40, %v348_v39 }
 0x10c   : > { %v351_v42 = vrot.slane %v350_v41, 1 }
 0x10e   : > { %v352_v43 = vadd.f32 %v351_v42, %v350_v41 }
 0x110   : > { %v354_v44 = vmul.f32 0.03125, %v352_v43 }
 0x112   : > { %v355_v45 = vsub.f32 %v329_v32, %v354_v44  ;;  %v356_v46 = vsub.f32 %v332_v34, %v354_v44  ;;  %v357_v47 = vsub.f32 %v725_v31, %v354_v44  ;;  %v358_v48 = vsub.f32 %v726_v33, %v354_v44 }
 0x114   : > { %v359_v49 = vmul.f32 %v355_v45, %v355_v45  ;;  %v360_v50 = vmul.f32 %v356_v46, %v356_v46  ;;  %v361_v52 = vmul.f32 %v357_v47, %v357_v47  ;;  %v362_v53 = vmul.f32 %v358_v48, %v358_v48 }
 0x116   : > { %v363_v51 = vadd.f32 %v360_v50, %v359_v49 }
 0x118   : > { %v364_v54 = vadd.f32 %v363_v51, %v361_v52 }
 0x11a   : > { %v365_v55 = vadd.f32 %v364_v54, %v362_v53  ;;  %v513_v54 = vpop.permute.xlu1 %512 }
 0x11c   : > { %v366_v56 = vrot.slane %v365_v55, 4 }
 0x11e   : > { %v367_v57 = vadd.f32 %v366_v56, %v365_v55  ;;  %v524_v55 = vpop.permute.xlu1 %523 }
 0x120   : > { %v368_v58 = vrot.slane %v367_v57, 2 }
 0x122   : > { %v369_v59 = vadd.f32 %v368_v58, %v367_v57  ;;  %v518_v57 = vpop.permute.xlu0 %517 }
 0x124   : > { %v370_v60 = vrot.slane %v369_v59, 1 }
 0x126   : > { %v371_v61 = vadd.f32 %v370_v60, %v369_v59 }
 0x128   : > { %v372_v62 = vmul.f32 0.03125, %v371_v61 }
 0x12a   : > { %v373_v63 = vadd.f32 1e-05, %v372_v62  ;;  %v528_v62 = vpop.permute.xlu1 %527 }
 0x12c   : > { %816 = vrsqrt.f32 %v373_v63 }
 0x139   : > { %v817_v6 = vpop.eup %816 }
 0x13a   : > { %v377_v7 = vmul.f32 %v817_v6, %v357_v47  ;;  %v378_v8 = vmul.f32 %v817_v6, %v358_v48  ;;  %v375_v9 = vmul.f32 %v817_v6, %v355_v45  ;;  %v376_v10 = vmul.f32 %v817_v6, %v356_v46 }
 0x13c   : > { %v405_v13 = vmul.f32 %v396_v0, %v377_v7  ;;  %v406_v14 = vmul.f32 %v401_v2, %v378_v8  ;;  %v403_v15 = vmul.f32 %v386_v5, %v375_v9  ;;  %v404_v16 = vmul.f32 %v391_v4, %v376_v10  ;;  %v277_v4 = vld [vmem:[%s1037_s1 + $0x18] sm:$0xf]  ;;  %v539_v5 = vpop.permute.xlu0 %538 }
 0x13e   : > { %v425_v17 = vadd.f32 %v417_v1, %v405_v13  ;;  %v426_v18 = vadd.f32 %v421_v3, %v406_v14  ;;  %v424_v19 = vadd.f32 %v413_v11, %v404_v16  ;;  %v423_v20 = vadd.f32 %v409_v12, %v403_v15 }
 0x140   : > { %v429_v21 = vmax.f32 %v425_v17, 0.0  ;;  %v430_v22 = vmax.f32 %v426_v18, 0.0  ;;  %v428_v23 = vmax.f32 %v424_v19, 0.0  ;;  %v427_v25 = vmax.f32 %v423_v20, 0.0 }
 0x142   : > { %v432_v26 = vpack.c.bf16 %v430_v22, %v429_v21  ;;  %v431_v27 = vpack.c.bf16 %v428_v23, %v427_v25 }
 0x144   : > { %728 = vmatpush3.bf16.msra.mxu1 %v432_v26 }
 0x145   : > { %729 = vmatprep.subr.bf16.mxu1 %v880_v28 }
 0x148   : > { %730 = vmatpush3.bf16.msra.mxu1 %v431_v27 }
 0x149   : > { %735 = vmatprep.subr.bf16.mxu1 %v880_v28 }
 0x14b   : > { %732 = vmatmul.mubr.msk.bf16.vlgmr.msra.gmra.mxu1 %vm438_vm2, %v815_v29 }
 0x14c   : > { %737 = vmatprep.mubr.msk.bf16.mxu1 %vm881_vm1, %v880_v28 }
 0x20b   : > { %v476_v31 = vpop.f32.mrf.mxu1 }
 0x20d   : > { %v733_v32 = vpop.f32.mrf.mxu1 }
 0x20f   : > { %v479_v33 = vpop.f32.mrf.mxu1 }
 0x210   : > { %v483_v34 = vadd.f32 %v479_v33, %v476_v31 }
 0x211   : > { %v734_v35 = vpop.f32.mrf.mxu1 }
 0x212   : > { %v484_v36 = vrot.slane %v483_v34, 4 }
 0x214   : > { %v485_v37 = vadd.f32 %v484_v36, %v483_v34 }
 0x216   : > { %v486_v38 = vrot.slane %v485_v37, 2 }
 0x218   : > { %v487_v39 = vadd.f32 %v486_v38, %v485_v37 }
 0x21a   : > { %v488_v40 = vrot.slane %v487_v39, 1 }
 0x21c   : > { %v489_v41 = vadd.f32 %v488_v40, %v487_v39 }
 0x21e   : > { %v491_v42 = vmul.f32 0.0625, %v489_v41 }
 0x220   : > { %v493_v43 = vsub.f32 %v479_v33, %v491_v42  ;;  %v492_v44 = vsub.f32 %v476_v31, %v491_v42 }
 0x222   : > { %v495_v45 = vmul.f32 %v493_v43, %v493_v43  ;;  %v494_v28 = vmul.f32 %v492_v44, %v492_v44 }
 0x224   : > { %v496_v46 = vadd.f32 %v495_v45, %v494_v28 }
 0x226   : > { %v497_v47 = vrot.slane %v496_v46, 4 }
 0x228   : > { %v498_v48 = vadd.f32 %v497_v47, %v496_v46 }
 0x22a   : > { %v499_v24 = vrot.slane %v498_v48, 2 }
 0x22c   : > { %v500_v49 = vadd.f32 %v499_v24, %v498_v48 }
 0x22e   : > { %v501_v50 = vrot.slane %v500_v49, 1 }
 0x230   : > { %v502_v51 = vadd.f32 %v501_v50, %v500_v49 }
 0x232   : > { %v503_v52 = vmul.f32 0.0625, %v502_v51 }
 0x234   : > { %v504_v53 = vadd.f32 1e-05, %v503_v52 }
 0x236   : > { %818 = vrsqrt.f32 %v504_v53 }
 0x243   : > { %v819_v56 = vpop.eup %818 }
 0x244   : > { %v506_v58 = vmul.f32 %v819_v56, %v492_v44  ;;  %v507_v59 = vmul.f32 %v819_v56, %v493_v43 }
 0x246   : > { %v520_v60 = vmul.f32 %v513_v54, %v506_v58  ;;  %v521_v61 = vmul.f32 %v518_v57, %v507_v59 }
 0x248   : > { %v530_v63 = vadd.f32 %v524_v55, %v520_v60  ;;  %v531_v0 = vadd.f32 %v528_v62, %v521_v61 }
 0x24a   : > { %v532_v1 = vmax.f32 %v530_v63, 0.0  ;;  %v533_v2 = vmax.f32 %v531_v0, 0.0 }
 0x24c   : > { %v534_v3 = vpack.c.bf16 %v533_v2, %v532_v1 }
 0x24e   : > { %736 = vmatpush3.bf16.msra.mxu1 %v534_v3 }
 0x251   : > { %738 = vmatmul.mubr.msk.bf16.vlgmr.msra.gmra.mxu1 %vm541_vm3, %v277_v4 }
 0x311   : > { %v579_v6 = vpop.f32.mrf.mxu1 }
 0x312   : > { %v580_v7 = vadd.f32 %v579_v6, %v539_v5 }
 0x313   : > { %v739_v8 = vpop.f32.mrf.mxu1 }
 0x314   : > { %v585_v9 = vmul.f32 %v580_v7, %v580_v7 }
 0x315   : > { %v582_v10 = vpop.f32.mrf.mxu1 }
 0x316   : > { %v586_v11 = vrot.slane %v585_v9, 4 }
 0x317   : > { %v740_v12 = vpop.f32.mrf.mxu1 }
 0x318   : > { %v587_v13 = vadd.f32 %v586_v11, %v585_v9 }
 0x31a   : > { %v588_v14 = vrot.slane %v587_v13, 2 }
 0x31c   : > { %v589_v15 = vadd.f32 %v588_v14, %v587_v13 }
 0x31e   : > { %v590_v16 = vrot.slane %v589_v15, 1 }
 0x320   : > { %v591_v17 = vadd.f32 %v590_v16, %v589_v15 }
 0x322   : > { %v592_v18 = vmax.f32 %v591_v17, 1e-24 }
 0x324   : > { %820 = vrsqrt.f32 %v592_v18 }
 0x331   : > { %v821_v19 = vpop.eup %820 }
 0x332   : > { %v594_v20 = vmul.f32 %v821_v19, %v580_v7 }
 0x334   : > { %595 = vst [vmem:[%s257_s23] sm:$0x7] %v594_v20 }
 0x335 PF: > { %s13_s18 = sadd.s32 1, %s876_s18   ;;  %s1040_s12 = smov %s856_s13 }
 0x336   : > { %p10_p12 = scmp.ge.s32.totalorder %s13_s18, 6   ;;  %s1041_s13 = smov %s956_s25 }
 0x337   : > { %s1042_s14 = smov %s868_s16  ;;  %s1043_s15 = smov %s872_s17 }
 0x338   : > { %s1044_s16 = smov %s1047_s19  ;;  %s1045_s17 = smov %s1051_s20 }
 0x339   :  { %12 = sbr.rel (!%p10_p12) target bundleno = 4 (0x4), region = 105 }

</bundles_post_ra>
